<compile_context>
chip_gen: v5e
topology: v5e:2x2
jax: 0.10.0
libtpu: 0.0.40
codegen_flags: <defaults>
</compile_context>

<pallas_src>
import jax
import jax.numpy as jnp
from jax import lax
from jax.experimental import pallas as pl
from jax.experimental.pallas import tpu as pltpu


def _round_up(x, m):
    return ((x + m - 1) // m) * m


def _embed_kernel(patches_ref, w_ref, pos_ref, out_ref):
    # patches_ref: (1, TN, Kp) compute_dtype     w_ref: (Kp, TD) compute_dtype
    # pos_ref:     (TN, TD)    float32           out_ref: (1, TN, TD)
    proj = jnp.dot(patches_ref[0], w_ref[...],
                   preferred_element_type=jnp.float32)        # MXU, f32 acc
    out_ref[0] = (proj + pos_ref[...]).astype(out_ref.dtype)  # bias+pos folded


def siglip_vision_embeddings(pixel_values, conv_weight, conv_bias, pos_emb,
                             patch_size, *, compute_dtype=jnp.bfloat16,
                             out_dtype=None):
    """pixel_values: (B, C, H, W) NCHW (like the PyTorch module).
       conv_weight:  (D, C, P, P)   conv_bias: (D,)   pos_emb: (N, D)."""
    B, C, H, W = pixel_values.shape
    P = patch_size
    gh, gw = H // P, W // P
    N = gh * gw                        # num_patches
    D = conv_weight.shape[0]           # embed_dim
    K = C * P * P                      # per-patch feature dim
    if out_dtype is None:
        out_dtype = pixel_values.dtype

    # --- glue (plain JAX): extract non-overlapping patches, (c, kh, kw) order
    x = pixel_values.reshape(B, C, gh, P, gw, P)
    x = jnp.transpose(x, (0, 2, 4, 1, 3, 5))           # (B, gh, gw, C, P, P)
    patches = x.reshape(B, N, K)
    # TODO(synk): if the caller can provide NHWC pixels, this transpose moves
    # contiguous (P*C) vectors instead of a lane-unfriendly size-P last dim.

    # --- alignment padding (zero-pad: numerically exact, sliced off at the end)
    Kp = _round_up(K, 128)                              # contraction dim
    Dp = _round_up(D, 128)                              # lane dim
    if N >= 256:
        TN = 256
        Np = _round_up(N, TN)
    else:
        TN = Np = _round_up(N, 8)                       # sublane alignment
    TD = next(t for t in (512, 256, 384, 128) if Dp % t == 0)

    patches = jnp.pad(patches, ((0, 0), (0, Np - N), (0, Kp - K)))
    patches = patches.astype(compute_dtype)

    w_t = conv_weight.reshape(D, K).T                   # (K, D)
    w_t = jnp.pad(w_t, ((0, Kp - K), (0, Dp - D))).astype(compute_dtype)

    # Fold conv bias into the position table: one fewer input / DMA / VPU add.
    pos_bias = (pos_emb.astype(jnp.float32)
                + conv_bias.astype(jnp.float32)[None, :])
    pos_bias = jnp.pad(pos_bias, ((0, Np - N), (0, Dp - D)))

    grid = (B, Np // TN, Dp // TD)

    c_bytes = jnp.dtype(compute_dtype).itemsize
    o_bytes = jnp.dtype(out_dtype).itemsize
    cost = pl.CostEstimate(
        flops=2 * B * Np * Kp * Dp,
        transcendentals=0,
        bytes_accessed=(B * Np * Kp * c_bytes          # patches
                        + Kp * Dp * c_bytes            # weight
                        + Np * Dp * 4                  # pos+bias (f32)
                        + B * Np * Dp * o_bytes))      # output

    out = pl.pallas_call(
        _embed_kernel,
        out_shape=jax.ShapeDtypeStruct((B, Np, Dp), out_dtype),
        grid_spec=pltpu.PrefetchScalarGridSpec(
            num_scalar_prefetch=0,
            grid=grid,
            in_specs=[
                pl.BlockSpec((1, TN, Kp), lambda b, n, d: (b, n, 0)),
                pl.BlockSpec((Kp, TD), lambda b, n, d: (0, d)),
                pl.BlockSpec((TN, TD), lambda b, n, d: (n, d)),
            ],
            out_specs=pl.BlockSpec((1, TN, TD), lambda b, n, d: (b, n, d)),
        ),
        compiler_params=pltpu.CompilerParams(
            dimension_semantics=("parallel", "parallel", "parallel")),
        cost_estimate=cost,
    )(patches, w_t, pos_bias)

    return out[:, :N, :D]


def reference(pixel_values, conv_weight, conv_bias, pos_emb, patch_size):
    """Pure-JAX reference matching the PyTorch forward (conv -> flatten ->
       transpose -> + pos_emb)."""
    conv_out = lax.conv_general_dilated(
        pixel_values, conv_weight,
        window_strides=(patch_size, patch_size),
        padding="VALID",
        dimension_numbers=("NCHW", "OIHW", "NCHW"),
    ) + conv_bias[None, :, None, None]                  # (B, D, gh, gw)
    B, D = conv_out.shape[0], conv_out.shape[1]
    emb = conv_out.reshape(B, D, -1)                    # flatten(2)
    emb = jnp.transpose(emb, (0, 2, 1))                 # transpose(1, 2)
    return emb + pos_emb[None]


if __name__ == "__main__":
    # Small synthetic config consistent with the module:
    #   num_channels=3, image_size=16, patch_size=4 -> num_patches=16
    #   hidden_size (embed_dim) = 32
    batch = 2
    num_channels = 3
    image_size = 16
    patch_size = 4
    embed_dim = 32
    num_patches = (image_size // patch_size) ** 2

    key = jax.random.PRNGKey(0)
    k_px, k_w, k_b, k_pos = jax.random.split(key, 4)

    pixel_values = jax.random.normal(
        k_px, (batch, num_channels, image_size, image_size), dtype=jnp.float32)
    conv_weight = 0.02 * jax.random.normal(
        k_w, (embed_dim, num_channels, patch_size, patch_size),
        dtype=jnp.float32)
    conv_bias = 0.01 * jax.random.normal(k_b, (embed_dim,), dtype=jnp.float32)
    pos_emb = 0.02 * jax.random.normal(
        k_pos, (num_patches, embed_dim), dtype=jnp.float32)

    ref = reference(pixel_values, conv_weight, conv_bias, pos_emb, patch_size)

    # Exact f32 compute path (tight tolerance against the conv reference).
    out_f32 = siglip_vision_embeddings(pixel_values, conv_weight, conv_bias,
                                       pos_emb, patch_size,
                                       compute_dtype=jnp.float32)
    out_f32 = jax.block_until_ready(out_f32)
    assert out_f32.shape == (batch, num_patches, embed_dim), out_f32.shape
    assert jnp.allclose(out_f32, ref, atol=1e-5, rtol=1e-5), \
        float(jnp.max(jnp.abs(out_f32 - ref)))

    # Default fast path: bf16 inputs / f32 MXU accumulation (loosened tol).
    out_bf16 = siglip_vision_embeddings(pixel_values, conv_weight, conv_bias,
                                        pos_emb, patch_size)
    out_bf16 = jax.block_until_ready(out_bf16)
    assert out_bf16.shape == (batch, num_patches, embed_dim), out_bf16.shape
    assert jnp.allclose(out_bf16, ref, atol=2e-2, rtol=2e-2), \
        float(jnp.max(jnp.abs(out_bf16 - ref)))

    print("KERNEL_OK")
</pallas_src>

<mosaic_0001>
module attributes {stable_mosaic.version = 11 : i64} {
  func.func @_embed_kernel(%arg0: i32, %arg1: i32, %arg2: i32, %arg3: memref<1x16x128xf32, #tpu.memory_space<vmem>>, %arg4: memref<128x128xf32, #tpu.memory_space<vmem>>, %arg5: memref<16x128xf32, #tpu.memory_space<vmem>>, %arg6: memref<1x16x128xf32, #tpu.memory_space<vmem>>) attributes {dimension_semantics = [#tpu.dimension_semantics<parallel>, #tpu.dimension_semantics<parallel>, #tpu.dimension_semantics<parallel>], iteration_bounds = array<i64: 2, 1, 1>, scalar_prefetch = 0 : i64, scratch_operands = 0 : i64, tpu.core_type = #tpu.core_type<tc>, window_params = [{transform_indices = @transform_0, window_bounds = array<i64: 1, 16, 128>}, {transform_indices = @transform_1, window_bounds = array<i64: 128, 128>}, {transform_indices = @transform_2, window_bounds = array<i64: 16, 128>}, {transform_indices = @transform_3, window_bounds = array<i64: 1, 16, 128>}]} {
    %c0 = arith.constant 0 : index
    %c0_0 = arith.constant 0 : index
    %c0_1 = arith.constant 0 : index
    %0 = vector.load %arg3[%c0, %c0_0, %c0_1] : memref<1x16x128xf32, #tpu.memory_space<vmem>>, vector<1x16x128xf32>
    %1 = vector.shape_cast %0 : vector<1x16x128xf32> to vector<16x128xf32>
    %c0_2 = arith.constant 0 : index
    %c0_3 = arith.constant 0 : index
    %2 = vector.load %arg4[%c0_2, %c0_3] : memref<128x128xf32, #tpu.memory_space<vmem>>, vector<128x128xf32>
    %cst = arith.constant dense<0.000000e+00> : vector<16x128xf32>
    %3 = tpu.matmul %1, %2, %cst {dimension_numbers = #tpu.dot_dimension_numbers<[1], [0], [0], [1], [0, 0, 1, 1], [], []>} : vector<16x128xf32>, vector<128x128xf32>, vector<16x128xf32> -> vector<16x128xf32>
    %c0_4 = arith.constant 0 : index
    %c0_5 = arith.constant 0 : index
    %4 = vector.load %arg5[%c0_4, %c0_5] : memref<16x128xf32, #tpu.memory_space<vmem>>, vector<16x128xf32>
    %5 = arith.addf %3, %4 : vector<16x128xf32>
    %c0_6 = arith.constant 0 : index
    %c0_7 = arith.constant 0 : index
    %c0_8 = arith.constant 0 : index
    %6 = vector.load %arg6[%c0_6, %c0_7, %c0_8] : memref<1x16x128xf32, #tpu.memory_space<vmem>>, vector<1x16x128xf32>
    %7 = vector.shape_cast %6 : vector<1x16x128xf32> to vector<16x128xf32>
    %8 = vector.shape_cast %5 : vector<16x128xf32> to vector<1x16x128xf32>
    tpu.vector_store %arg6[%c0_6, %c0_7, %c0_8], %8 {strides = array<i32>} : memref<1x16x128xf32, #tpu.memory_space<vmem>>, vector<1x16x128xf32>,
    return
  }
  func.func @transform_0(%arg0: i32, %arg1: i32, %arg2: i32) -> (i32, i32, i32) {
    %c0_i32 = arith.constant 0 : i32
    %c0_i32_0 = arith.constant 0 : i32
    return %arg0, %arg1, %c0_i32 : i32, i32, i32
  }
  func.func @transform_1(%arg0: i32, %arg1: i32, %arg2: i32) -> (i32, i32) {
    %c0_i32 = arith.constant 0 : i32
    %c0_i32_0 = arith.constant 0 : i32
    return %c0_i32, %arg2 : i32, i32
  }
  func.func @transform_2(%arg0: i32, %arg1: i32, %arg2: i32) -> (i32, i32) {
    %c0_i32 = arith.constant 0 : i32
    return %arg1, %arg2 : i32, i32
  }
  func.func @transform_3(%arg0: i32, %arg1: i32, %arg2: i32) -> (i32, i32, i32) {
    %c0_i32 = arith.constant 0 : i32
    return %arg0, %arg1, %arg2 : i32, i32, i32
  }
}

</mosaic_0001>

<bundles_post_ra>
// kernel: tpu_custom_call.1
= control target key start
LH: loop header
LB: loop body
LE: loop exit
PB: predicated region body
PF: predicated region fallthrough
CT: control target
= control target key end

     0   :  { %8 = vsyncpa [#allocation3], 0  ;;  %s943_s0 = inlined_call_operand.hbm [shape: f32[2,16,128], index: 0, kind: input, shape index: {}]   ;;  %s944_s1 = inlined_call_operand.hbm [shape: f32[128,128], index: 1, kind: input, shape index: {}]   ;;  %s945_s2 = inlined_call_operand.hbm [shape: f32[16,128], index: 2, kind: input, shape index: {}]   ;;  %s946_s3 = inlined_call_operand.hbm [shape: f32[2,16,128], index: 3, kind: output, shape index: {}]  }
   0x1   :  { %10 = vsyncpa [#allocation3 + $0x1], 0 }
   0x2   :  { %11 = vsyncpa [#allocation6], 0 }
   0x3   :  { %12 = vsyncpa [#allocation4], 0 }
   0x4   :  { %14 = vsyncpa [#allocation4 + $0x1], 0  ;;  %s780_s12 = smov 0   ;;  %s782_s13 = smov 0  }
   0x5   :  { %s784_s14 = smov 0   ;;  %s786_s15 = smov 0  }
   0x6   :  { %s788_s16 = smov 0   ;;  %s790_s17 = smov 0  }
   0x7 LB: > { %s452_s18 = sadd.s32 4294967295, %s752_s17   ;;  %s453_s19 = sadd.s32 4294967294, %s752_s17   ;;  %s752_s17 = sphi %s790_s17, %s20_s17   ;;  %s748_s16 = sphi %s788_s16, %s956_s16   ;;  %s744_s15 = sphi %s786_s15, %s955_s15   ;;  %s740_s14 = sphi %s784_s14, %s954_s14   ;;  %s736_s13 = sphi %s782_s13, %s953_s13   ;;  %s732_s12 = sphi %s780_s12, %s952_s12  }
   0x8   : > { %p61_p0 = scmp.ne.s32.totalorder %s736_s13, %s732_s12  ;;  %p816_p1 = scmp.eq.s32.totalorder %s452_s18, 0 }
   0x9   : > { %p149_p2 = scmp.eq.s32.totalorder %s453_s19, 1  ;;  %p454_p4 = scmp.ge.s32.totalorder %s752_s17, 1 }
   0xa   : > { %p822_p3 = por %p816_p1, %p61_p0  ;;  %p156_p6 = scmp.lt.s32.totalorder %s752_s17, 3 }
   0xb   : > { %p827_p5 = por %p149_p2, %p61_p0  ;;  %s169_s25 = sshll.u32 %s944_s1, 4  ;;  %s170_s25 = int_to_ptr.hbm [resolvable:$true] %s169_s25 }
   0xc   : > { %p835_p7 = pnand %p454_p4, %p156_p6  ;;  %s754_s27 = smov [#allocation5]  }
   0xd   : > { %s171_s28 = sshll.u32 %s754_s27, 4  ;;  %p457_p10 = scmp.ge.s32.totalorder %s752_s17, 2  ;;  %s172_s28 = int_to_ptr.vmem [resolvable:$true] %s171_s28 }
   0xe   : > { %p501_p8 = pneg %p835_p7  ;;  %s187_s4 = sshll.u32 %s945_s2, 4  ;;  %s188_s4 = int_to_ptr.hbm [resolvable:$true] %s187_s4 }
   0xf   : > { %s755_s5 = smov 128   ;;  %s756_s6 = smov 8  }
  0x10   : > { %p502_p9 = pnand %p501_p8, %p816_p1  ;;  %s757_s7 = smov [#allocation7]  }
  0x11   : > { %s189_s8 = sshll.u32 %s757_s7, 4  ;;  %p143_p11 = scmp.eq.s32.totalorder %s452_s18, 1  ;;  %s190_s8 = int_to_ptr.vmem [resolvable:$true] %s189_s8 }
  0x12   : > { %504 = dma.hbm_to_vmem [thread:$0]  (!%p502_p9), %s170_s25, 2048, %s172_s28, [#allocation6], %s755_s5, %s755_s5, %s756_s6  }
  0x13   : > { %507 = dma.hbm_to_vmem [thread:$0]  (!%p502_p9), %s188_s4, 256, %s190_s8, [#allocation6], %s755_s5, %s755_s5, %s756_s6  }
  0x14   : > { %s39_s9 = sadd.s32 1, %s748_s16  ;;  %s48_s10 = sadd.s32 1, %s740_s14 }
  0x15   : > { %p41_p12 = scmp.ge.s32.totalorder %s39_s9, 2  ;;  %p55_p13 = scmp.ne.s32.totalorder %s740_s14, %s736_s13 }
  0x16   : > { %p56_p0 = scmp.eq.s32.totalorder %s752_s17, 0  ;;  %p518_p4 = scmp.lt.s32.totalorder %s752_s17, 2 }
  0x17   : > { %s958_s9 = smov (%p41_p12, %s39_s9), 0  ;;  %p862_p2 = por %p143_p11, %p55_p13 }
  0x18   : > { %s43_s19 = ssub.s32 %s748_s16, %s958_s9  ;;  %s203_s23 = sand.u32 1, %s740_s14  }
  0x19   : > { %p46_p6 = scmp.eq.s32.totalorder %s43_s19, 0  ;;  %p57_p8 = por %p56_p0, %p55_p13 }
  0x1a   : > { %s458_s24 = sshll.u32 %s203_s23, 4  ;;  %s471_s18 = sshll.u32 %s748_s16, 4 }
  0x1b   : > { %s872_s25 = scalar_select %p46_p6, %s740_s14, %s48_s10  }
  0x1c   : > { %s214_s29 = scalar_lea.hbm %s943_s0, %s471_s18  ;;  %s207_s4 = scalar_lea.vmem [#allocation2], %s458_s24 }
  0x1d   : > { %s215_s30 = sshll.u32 %s214_s29, 4  ;;  %s217_s7 = sshll.u32 %s207_s4, 4  ;;  %s216_s30 = int_to_ptr.hbm [resolvable:$true] %s215_s30  ;;  %s218_s7 = int_to_ptr.vmem [resolvable:$true] %s217_s7 }
  0x1e   : > { %p509_p9 = pnand %p518_p4, %p57_p8  ;;  %s204_s8 = scalar_lea.sflag [#allocation3], %s203_s23 }
  0x1f   : > { %229 = sbr.rel (%p835_p7) target bundleno = 204 (0xcc), region = 32  ;;  %s885_s10 = sand.u32 (!%p835_p7), 1, %s736_s13  }
  0x20   : > { %511 = dma.hbm_to_vmem [thread:$0]  (!%p509_p9), %s216_s30, 256, %s218_s7, %s204_s8, %s755_s5, %s755_s5, %s756_s6  }
  0x21   : > { %s462_s19 = sshll.u32 (!%p835_p7), %s885_s10, 4  ;;  %s232_s24 = scalar_lea.sflag (!%p835_p7), [#allocation3], %s885_s10 }
  0x22   : > { %s891_s18 = scalar_lea.vmem (!%p835_p7), [#allocation2], %s462_s19 }
  0x24   : > { %719 = dma.done.wait (%p822_p3), %s232_s24, 256  }
  0x25   : > { %721 = vsyncadd (%p822_p3), %s232_s24, 4294967040 }
  0x26   : > { %723 = dma.done.wait (%p816_p1), [#allocation6], 2304  }
  0x27   : > { %725 = vsyncadd (%p816_p1), [#allocation6], 4294964992  ;;  %v289_v0 = vld [vmem:[#allocation5 + $0x78] sm:$0xff]  ;;  %v288_v1 = vld [vmem:[#allocation5 + $0x70] sm:$0xff]  ;;  %s472_s20 = sshll.u32 %s744_s15, 4  ;;  %s268_s6 = scalar_lea.vmem [#allocation8], %s462_s19 }
  0x28   : > { %292 = vmatpush.msra.mxu0 %v289_v0  ;;  %473 = vmatpush.msra.mxu1 %v289_v0  ;;  %v287_v2 = vld [vmem:[#allocation5 + $0x68] sm:$0xff]  ;;  %v286_v3 = vld [vmem:[#allocation5 + $0x60] sm:$0xff]  ;;  %v285_v4 = vld [vmem:[#allocation5 + $0x58] sm:$0xff]  ;;  %s332_s5 = scalar_lea.hbm %s946_s3, %s472_s20  ;;  %s333_s23 = sshll.u32 %s268_s6, 4  ;;  %s334_s23 = int_to_ptr.vmem [resolvable:$true] %s333_s23 }
  0x29   : > { %v284_v5 = vld [vmem:[#allocation5 + $0x50] sm:$0xff]  ;;  %v283_v6 = vld [vmem:[#allocation5 + $0x48] sm:$0xff]  ;;  %v282_v7 = vld [vmem:[#allocation5 + $0x40] sm:$0xff]  ;;  %s335_s27 = sshll.u32 %s332_s5, 4  ;;  %s318_s15 = scalar_lea.sflag [#allocation4], %s885_s10  ;;  %s336_s27 = int_to_ptr.hbm [resolvable:$true] %s335_s27 }
  0x2a   : > { %293 = vmatpush.msra.mxu0 %v288_v1  ;;  %474 = vmatpush.msra.mxu1 %v288_v1  ;;  %v281_v8 = vld [vmem:[#allocation5 + $0x38] sm:$0xff]  ;;  %v280_v9 = vld [vmem:[#allocation5 + $0x30] sm:$0xff]  ;;  %v279_v10 = vld [vmem:[#allocation5 + $0x28] sm:$0xff]  ;;  %s680_s28 = sshra.s32 %s336_s27, 4  ;;  %s686_s7 = scalar_lea.hbm %s946_s3, 32  ;;  %s681_s28 = int_to_ptr.hbm [resolvable:$true] %s680_s28 }
  0x2b   : > { %v278_v11 = vld [vmem:[#allocation5 + $0x20] sm:$0xff]  ;;  %v277_v12 = vld [vmem:[#allocation5 + $0x18] sm:$0xff]  ;;  %v276_v13 = vld [vmem:[#allocation5 + $0x10] sm:$0xff]  ;;  %s682_s29 = scalar_lea.hbm %s681_s28, 16  ;;  %p687_p11 = scmp.lt.s32.totalorder %s681_s28, %s946_s3 }
  0x2c   : > { %294 = vmatpush.msra.mxu0 %v287_v2  ;;  %475 = vmatpush.msra.mxu1 %v287_v2  ;;  %v275_v14 = vld [vmem:[#allocation5 + $0x8] sm:$0xff]  ;;  %v274_v15 = vld [vmem:[#allocation5] sm:$0xff]  ;;  %p683_p1 = scmp.ne.s32.totalorder %s681_s28, %s682_s29  ;;  %p688_p12 = scmp.lt.s32.totalorder %s686_s7, %s682_s29 }
  0x2d   : > { %v272_v16 = vld [vmem:[%s891_s18] sm:$0xff]  ;;  %v273_v17 = vld [vmem:[%s891_s18 + $0x8] sm:$0xff] }
  0x2e   : > { %295 = vmatpush.msra.mxu0 %v286_v3  ;;  %476 = vmatpush.msra.mxu1 %v286_v3  ;;  %v290_v18 = vld [vmem:[#allocation7] sm:$0xff]  ;;  %v291_v19 = vld [vmem:[#allocation7 + $0x8] sm:$0xff]  ;;  %p684_p3 = pnand %p683_p1, %p862_p2  ;;  %p689_p13 = por %p688_p12, %p687_p11 }
  0x30   : > { %296 = vmatpush.msra.mxu0 %v285_v4  ;;  %477 = vmatpush.msra.mxu1 %v285_v4  ;;  %p685_p7 = pneg %p684_p3 }
  0x32   : > { %297 = vmatpush.msra.mxu0 %v284_v5  ;;  %478 = vmatpush.msra.mxu1 %v284_v5  ;;  %p690_p0 = pnand %p689_p13, %p685_p7 }
  0x34   : > { %298 = vmatpush.msra.mxu0 %v283_v6  ;;  %479 = vmatpush.msra.mxu1 %v283_v6 }
  0x36   : > { %299 = vmatpush.msra.mxu0 %v282_v7  ;;  %480 = vmatpush.msra.mxu1 %v282_v7 }
  0x38   : > { %300 = vmatpush.msra.mxu0 %v281_v8  ;;  %481 = vmatpush.msra.mxu1 %v281_v8 }
  0x3a   : > { %301 = vmatpush.msra.mxu0 %v280_v9  ;;  %482 = vmatpush.msra.mxu1 %v280_v9 }
  0x3c   : > { %302 = vmatpush.msra.mxu0 %v279_v10  ;;  %483 = vmatpush.msra.mxu1 %v279_v10 }
  0x3e   : > { %303 = vmatpush.msra.mxu0 %v278_v11  ;;  %484 = vmatpush.msra.mxu1 %v278_v11 }
  0x40   : > { %304 = vmatpush.msra.mxu0 %v277_v12  ;;  %485 = vmatpush.msra.mxu1 %v277_v12 }
  0x42   : > { %305 = vmatpush.msra.mxu0 %v276_v13  ;;  %486 = vmatpush.msra.mxu1 %v276_v13 }
  0x44   : > { %306 = vmatpush.msra.mxu0 %v275_v14  ;;  %487 = vmatpush.msra.mxu1 %v275_v14 }
  0x46   : > { %307 = vmatpush.msra.mxu0 %v274_v15  ;;  %488 = vmatpush.msra.mxu1 %v274_v15 }
  0x47   : > { %308 = vmatmul.f32.vlgmr.msra.gmra.mxu0 %v272_v16  ;;  %311 = vmatmul.f32.vlgmr.msra.gmra.mxu1 %v273_v17 }
  0xc4   : > { %v309_v20 = vpop.f32.mrf.mxu0  ;;  %v312_v21 = vpop.f32.mrf.mxu1 }
  0xc5   : > { %v310_v22 = vadd.f32 %v309_v20, %v290_v18  ;;  %v313_v23 = vadd.f32 %v312_v21, %v291_v19 }
  0xc7   : > { %315 = vst [vmem:[%s268_s6] sm:$0xff] %v310_v22 }
  0xc8   : > { %316 = vst [vmem:[%s268_s6 + $0x8] sm:$0xff] %v313_v23 }
  0xc9   : > { %693 = shalt.err (!%p690_p0)
}
  0xca   : > { %s758_s10 = smov 128   ;;  %s759_s24 = smov 8  }
  0xcb   : > { %499 = dma.vmem_to_hbm [thread:$0]  (%p862_p2), %s334_s23, 256, %s336_s27, %s318_s15, %s758_s10, %s758_s10, %s759_s24  }
  0xcc PF: > { %s350_s18 = sand.u32 1, %s732_s12   ;;  %p513_p4 = pnand %p457_p10, %p827_p5 }
  0xcd   : > { %s351_s20 = scalar_lea.sflag [#allocation4], %s350_s18 }
  0xce   : > { %p514_p6 = pneg %p513_p4 }
  0xd0   : > { %727 = dma.done.wait (%p514_p6), %s351_s20, 256  }
  0xd1   : > { %729 = vsyncadd (%p514_p6), %s351_s20, 4294967040  ;;  %s20_s17 = sadd.s32 1, %s752_s17   ;;  %s952_s12 = smov %s736_s13 }
  0xd2   : > { %p17_p8 = scmp.ge.s32.totalorder %s20_s17, 4   ;;  %s953_s13 = smov %s740_s14 }
  0xd3   : > { %s954_s14 = smov %s872_s25  ;;  %s955_s15 = smov %s748_s16 }
  0xd4   : > { %s956_s16 = smov %s958_s9  ;;  %19 = sbr.rel (!%p17_p8) target bundleno = 7 (0x7), region = 87 }
  0xd9   :  { %357 = vsyncpa [#allocation3], 1 }
  0xda   :  { %359 = vsyncpa [#allocation3 + $0x1], 1 }
  0xdb   :  { %360 = vsyncpa [#allocation6], 1 }
  0xdc   :  { %361 = vsyncpa [#allocation4], 1 }
  0xdd   :  { %363 = vsyncpa [#allocation4 + $0x1], 1 }

</bundles_post_ra>
